<compile_context>
chip_gen: v7x
topology: tpu7x:2x2x1
jax: 0.10.0
libtpu: 0.0.40
codegen_flags: <defaults>
</compile_context>

<pallas_src>
import jax
import jax.numpy as jnp
from jax.experimental import pallas as pl
from jax.experimental.pallas import tpu as pltpu

_LANE = 128
_SUB = 8
_NUM_CORES = 2            # v7x has 2 TCs; extra axis is a cheap serial loop on v5e/v6e
_MAX_BLOCK_ROWS = 2048    # (2048,128) f32 tile = 1 MiB per input per buffer


def _round_up(x: int, m: int) -> int:
    return ((x + m - 1) // m) * m


def _bce_partial_kernel(p_ref, l_ref, acc_ref):
    """Accumulate vreg-shaped partial sums of t, l*t and l into acc_ref.

    acc_ref: (1, 3, 8, 128) f32 output block, resident across the reduction
    ("arbitrary") grid axis; one block per TensorCore.
    """
    i = pl.program_id(1)

    @pl.when(i == 0)
    def _():
        acc_ref[...] = jnp.zeros_like(acc_ref)

    p = p_ref[...].astype(jnp.float32)
    l = l_ref[...].astype(jnp.float32)

    # PyTorch F.binary_cross_entropy clamps each log term at -100 (this also
    # prevents 0 * (-inf) NaNs when p hits 0 or 1 and for zero padding).
    log_p = jnp.maximum(jnp.log(p), -100.0)
    log_1mp = jnp.maximum(jnp.log(1.0 - p), -100.0)
    # t = l*log_p + (1-l)*log_1mp, rewritten to save a mul/sub on the VPU.
    t = log_1mp + l * (log_p - log_1mp)
    lt = l * t

    rows = t.shape[0]
    g = rows // _SUB
    # Pure-VPU reduction (rows,128) -> (8,128); the single cross-lane (XLU)
    # reduce is deferred to the tiny wrapper epilogue.
    acc_ref[0, 0, :, :] += t.reshape(g, _SUB, _LANE).sum(axis=0)
    acc_ref[0, 1, :, :] += lt.reshape(g, _SUB, _LANE).sum(axis=0)
    acc_ref[0, 2, :, :] += l.reshape(g, _SUB, _LANE).sum(axis=0)


def _bce_partial_sums(preds: jax.Array, labels: jax.Array):
    """One streaming Pallas pass over preds/labels; returns (S_t, S_lt, S_l)."""
    assert preds.shape == labels.shape
    numel = int(preds.size)

    flat_p = preds.reshape(-1)
    flat_l = labels.reshape(-1)

    rows_min = _round_up(max(1, -(-numel // _LANE)), _SUB)
    block_rows = min(_MAX_BLOCK_ROWS,
                     _round_up(-(-rows_min // _NUM_CORES), _SUB))
    total_rows = _round_up(rows_min, block_rows * _NUM_CORES)

    pad = total_rows * _LANE - numel
    if pad:
        # Zero padding contributes exactly 0 to all three sums:
        #   l=0, p=0  =>  t = log(1)=0,  l*t = 0,  l = 0.
        flat_p = jnp.pad(flat_p, (0, pad))
        flat_l = jnp.pad(flat_l, (0, pad))

    p2 = flat_p.reshape(total_rows, _LANE)
    l2 = flat_l.reshape(total_rows, _LANE)

    total_blocks = total_rows // block_rows
    bpc = total_blocks // _NUM_CORES   # blocks per core (reduction-axis length)

    def in_index_map(c, i, _bpc=bpc):
        return (c * _bpc + i, 0)

    partial = pl.pallas_call(
        _bce_partial_kernel,
        out_shape=jax.ShapeDtypeStruct((_NUM_CORES, 3, _SUB, _LANE), jnp.float32),
        grid=(_NUM_CORES, bpc),
        in_specs=[
            pl.BlockSpec((block_rows, _LANE), in_index_map),
            pl.BlockSpec((block_rows, _LANE), in_index_map),
        ],
        out_specs=pl.BlockSpec((1, 3, _SUB, _LANE), lambda c, i: (c, 0, 0, 0)),
        compiler_params=pltpu.CompilerParams(
            dimension_semantics=("parallel", "arbitrary")),
    )(p2, l2)

    sums = jnp.sum(partial, axis=(0, 2, 3))   # (3,) — tiny epilogue outside kernel
    return sums[0], sums[1], sums[2]


def weighted_bce_loss_pallas(preds: jax.Array, labels: jax.Array) -> jax.Array:
    """WCE loss (reduction='sum') for NCHW float inputs, single Pallas pass."""
    numel = float(preds.size)
    s_t, s_lt, s_l = _bce_partial_sums(preds, labels)
    mean_l = s_l / numel                      # = 1 - beta
    # w = (1-beta) + (2*beta-1)*l = mean_l + (1-2*mean_l)*l
    # loss = sum(-w*t) = -mean_l*S_t - (1-2*mean_l)*S_lt
    return -(mean_l * s_t) - (1.0 - 2.0 * mean_l) * s_lt


def bce_loss_pallas(preds: jax.Array, labels: jax.Array) -> jax.Array:
    """Plain BCE (reduction='sum'); reuses the same streaming kernel."""
    s_t, _, _ = _bce_partial_sums(preds, labels)
    return -s_t


class Loss:
    """JAX/Pallas port of the PyTorch `Loss` module (default 'WCE' branch)."""

    def __init__(self, loss_function: str = "WCE"):
        self.name = loss_function

    def __call__(self, preds, labels):
        if self.name == "WCE":
            return weighted_bce_loss_pallas(preds, labels)
        if self.name == "BCE":
            return bce_loss_pallas(preds, labels)
        # TODO(synk): other branches (Dice/SSIM/IOU/Tversky/FTL++/HFL/NFL/ARST)
        # are not exercised by the default config and are not implemented here.
        raise NotImplementedError(self.name)


def _wce_reference(preds, labels):
    """Pure-JAX reference (exact original formula) for a sanity check."""
    beta = 1.0 - jnp.mean(labels)
    w = 1.0 - beta + (2.0 * beta - 1.0) * labels
    log_p = jnp.maximum(jnp.log(preds), -100.0)
    log_1mp = jnp.maximum(jnp.log(1.0 - preds), -100.0)
    return jnp.sum(-w * (labels * log_p + (1.0 - labels) * log_1mp))


if __name__ == "__main__":
    key = jax.random.PRNGKey(0)
    k1, k2 = jax.random.split(key)

    # Small NCHW shapes consistent with a segmentation-style loss.
    N, C, H, W = 2, 4, 16, 16
    preds = jax.nn.sigmoid(jax.random.normal(k1, (N, C, H, W), jnp.float32))
    labels = jax.random.bernoulli(k2, 0.3, (N, C, H, W)).astype(jnp.float32)

    loss_mod = Loss("WCE")
    out = jax.block_until_ready(loss_mod(preds, labels))

    ref = jax.block_until_ready(_wce_reference(preds, labels))
    assert jnp.allclose(out, ref, rtol=1e-4, atol=1e-3), (out, ref)

    print("KERNEL_OK")
</pallas_src>

<mosaic_0001>
module attributes {stable_mosaic.version = 11 : i64} {
  func.func @_bce_partial_kernel(%arg0: i32, %arg1: i32, %arg2: memref<8x128xf32, #tpu.memory_space<vmem>>, %arg3: memref<8x128xf32, #tpu.memory_space<vmem>>, %arg4: memref<1x3x8x128xf32, #tpu.memory_space<vmem>>) attributes {dimension_semantics = [#tpu.dimension_semantics<parallel>, #tpu.dimension_semantics<arbitrary>], iteration_bounds = array<i64: 2, 1>, scalar_prefetch = 0 : i64, scratch_operands = 0 : i64, tpu.core_type = #tpu.core_type<tc>, window_params = [{transform_indices = @transform_0, window_bounds = array<i64: 8, 128>}, {transform_indices = @transform_1, window_bounds = array<i64: 8, 128>}, {transform_indices = @transform_2, window_bounds = array<i64: 1, 3, 8, 128>}]} {
    %c0_i32 = arith.constant 0 : i32
    %0 = arith.cmpi eq, %arg1, %c0_i32 : i32
    %1 = arith.extui %0 : i1 to i32
    %c0_i32_0 = arith.constant 0 : i32
    %2 = arith.cmpi ne, %1, %c0_i32_0 : i32
    scf.if %2 {
      %cst_31 = arith.constant 0.000000e+00 : f32
      %41 = vector.broadcast %cst_31 : f32 to vector<1x3x8x128xf32>
      %c0_32 = arith.constant 0 : index
      %c0_33 = arith.constant 0 : index
      %c0_34 = arith.constant 0 : index
      %c0_35 = arith.constant 0 : index
      %42 = vector.load %arg4[%c0_32, %c0_33, %c0_34, %c0_35] : memref<1x3x8x128xf32, #tpu.memory_space<vmem>>, vector<1x3x8x128xf32>
      tpu.vector_store %arg4[%c0_32, %c0_33, %c0_34, %c0_35], %41 {strides = array<i32>} : memref<1x3x8x128xf32, #tpu.memory_space<vmem>>, vector<1x3x8x128xf32>,
    } else {
    }
    %c0 = arith.constant 0 : index
    %c0_1 = arith.constant 0 : index
    %3 = vector.load %arg2[%c0, %c0_1] : memref<8x128xf32, #tpu.memory_space<vmem>>, vector<8x128xf32>
    %c0_2 = arith.constant 0 : index
    %c0_3 = arith.constant 0 : index
    %4 = vector.load %arg3[%c0_2, %c0_3] : memref<8x128xf32, #tpu.memory_space<vmem>>, vector<8x128xf32>
    %5 = math.log %3 : vector<8x128xf32>
    %cst = arith.constant -1.000000e+02 : f32
    %6 = vector.broadcast %cst : f32 to vector<8x128xf32>
    %7 = arith.maximumf %5, %6 : vector<8x128xf32>
    %cst_4 = arith.constant 1.000000e+00 : f32
    %8 = vector.broadcast %cst_4 : f32 to vector<8x128xf32>
    %9 = arith.subf %8, %3 : vector<8x128xf32>
    %10 = math.log %9 : vector<8x128xf32>
    %cst_5 = arith.constant -1.000000e+02 : f32
    %11 = vector.broadcast %cst_5 : f32 to vector<8x128xf32>
    %12 = arith.maximumf %10, %11 : vector<8x128xf32>
    %13 = arith.subf %7, %12 : vector<8x128xf32>
    %14 = arith.mulf %4, %13 : vector<8x128xf32>
    %15 = arith.addf %12, %14 : vector<8x128xf32>
    %16 = arith.mulf %4, %15 : vector<8x128xf32>
    %c0_6 = arith.constant 0 : index
    %c0_7 = arith.constant 0 : index
    %c0_8 = arith.constant 0 : index
    %c0_9 = arith.constant 0 : index
    %17 = vector.load %arg4[%c0_6, %c0_7, %c0_8, %c0_9] : memref<1x3x8x128xf32, #tpu.memory_space<vmem>>, vector<1x1x8x128xf32>
    %18 = vector.shape_cast %17 : vector<1x1x8x128xf32> to vector<8x128xf32>
    %19 = vector.shape_cast %15 : vector<8x128xf32> to vector<1x8x128xf32>
    %cst_10 = arith.constant dense<0.000000e+00> : vector<8x128xf32>
    %20 = vector.multi_reduction <add>, %19, %cst_10 [0] : vector<1x8x128xf32> to vector<8x128xf32>
    %21 = arith.addf %18, %20 : vector<8x128xf32>
    %c0_11 = arith.constant 0 : index
    %c0_12 = arith.constant 0 : index
    %c0_13 = arith.constant 0 : index
    %c0_14 = arith.constant 0 : index
    %22 = vector.load %arg4[%c0_11, %c0_12, %c0_13, %c0_14] : memref<1x3x8x128xf32, #tpu.memory_space<vmem>>, vector<1x1x8x128xf32>
    %23 = vector.shape_cast %22 : vector<1x1x8x128xf32> to vector<8x128xf32>
    %24 = vector.shape_cast %21 : vector<8x128xf32> to vector<1x1x8x128xf32>
    tpu.vector_store %arg4[%c0_11, %c0_12, %c0_13, %c0_14], %24 {strides = array<i32>} : memref<1x3x8x128xf32, #tpu.memory_space<vmem>>, vector<1x1x8x128xf32>,
    %c0_15 = arith.constant 0 : index
    %c1 = arith.constant 1 : index
    %c0_16 = arith.constant 0 : index
    %c0_17 = arith.constant 0 : index
    %25 = vector.load %arg4[%c0_15, %c1, %c0_16, %c0_17] : memref<1x3x8x128xf32, #tpu.memory_space<vmem>>, vector<1x1x8x128xf32>
    %26 = vector.shape_cast %25 : vector<1x1x8x128xf32> to vector<8x128xf32>
    %27 = vector.shape_cast %16 : vector<8x128xf32> to vector<1x8x128xf32>
    %cst_18 = arith.constant dense<0.000000e+00> : vector<8x128xf32>
    %28 = vector.multi_reduction <add>, %27, %cst_18 [0] : vector<1x8x128xf32> to vector<8x128xf32>
    %29 = arith.addf %26, %28 : vector<8x128xf32>
    %c0_19 = arith.constant 0 : index
    %c1_20 = arith.constant 1 : index
    %c0_21 = arith.constant 0 : index
    %c0_22 = arith.constant 0 : index
    %30 = vector.load %arg4[%c0_19, %c1_20, %c0_21, %c0_22] : memref<1x3x8x128xf32, #tpu.memory_space<vmem>>, vector<1x1x8x128xf32>
    %31 = vector.shape_cast %30 : vector<1x1x8x128xf32> to vector<8x128xf32>
    %32 = vector.shape_cast %29 : vector<8x128xf32> to vector<1x1x8x128xf32>
    tpu.vector_store %arg4[%c0_19, %c1_20, %c0_21, %c0_22], %32 {strides = array<i32>} : memref<1x3x8x128xf32, #tpu.memory_space<vmem>>, vector<1x1x8x128xf32>,
    %c0_23 = arith.constant 0 : index
    %c2 = arith.constant 2 : index
    %c0_24 = arith.constant 0 : index
    %c0_25 = arith.constant 0 : index
    %33 = vector.load %arg4[%c0_23, %c2, %c0_24, %c0_25] : memref<1x3x8x128xf32, #tpu.memory_space<vmem>>, vector<1x1x8x128xf32>
    %34 = vector.shape_cast %33 : vector<1x1x8x128xf32> to vector<8x128xf32>
    %35 = vector.shape_cast %4 : vector<8x128xf32> to vector<1x8x128xf32>
    %cst_26 = arith.constant dense<0.000000e+00> : vector<8x128xf32>
    %36 = vector.multi_reduction <add>, %35, %cst_26 [0] : vector<1x8x128xf32> to vector<8x128xf32>
    %37 = arith.addf %34, %36 : vector<8x128xf32>
    %c0_27 = arith.constant 0 : index
    %c2_28 = arith.constant 2 : index
    %c0_29 = arith.constant 0 : index
    %c0_30 = arith.constant 0 : index
    %38 = vector.load %arg4[%c0_27, %c2_28, %c0_29, %c0_30] : memref<1x3x8x128xf32, #tpu.memory_space<vmem>>, vector<1x1x8x128xf32>
    %39 = vector.shape_cast %38 : vector<1x1x8x128xf32> to vector<8x128xf32>
    %40 = vector.shape_cast %37 : vector<8x128xf32> to vector<1x1x8x128xf32>
    tpu.vector_store %arg4[%c0_27, %c2_28, %c0_29, %c0_30], %40 {strides = array<i32>} : memref<1x3x8x128xf32, #tpu.memory_space<vmem>>, vector<1x1x8x128xf32>,
    return
  }
  func.func @transform_0(%arg0: i32, %arg1: i32) -> (i32, i32) {
    %c1_i32 = arith.constant 1 : i32
    %0 = arith.muli %arg0, %c1_i32 : i32
    %1 = arith.addi %0, %arg1 : i32
    %c0_i32 = arith.constant 0 : i32
    %c0_i32_0 = arith.constant 0 : i32
    return %1, %c0_i32 : i32, i32
  }
  func.func @transform_1(%arg0: i32, %arg1: i32) -> (i32, i32) {
    %c1_i32 = arith.constant 1 : i32
    %0 = arith.muli %arg0, %c1_i32 : i32
    %1 = arith.addi %0, %arg1 : i32
    %c0_i32 = arith.constant 0 : i32
    %c0_i32_0 = arith.constant 0 : i32
    return %1, %c0_i32 : i32, i32
  }
  func.func @transform_2(%arg0: i32, %arg1: i32) -> (i32, i32, i32, i32) {
    %c0_i32 = arith.constant 0 : i32
    %c0_i32_0 = arith.constant 0 : i32
    %c0_i32_1 = arith.constant 0 : i32
    %c0_i32_2 = arith.constant 0 : i32
    return %arg0, %c0_i32, %c0_i32_0, %c0_i32_1 : i32, i32, i32, i32
  }
}

</mosaic_0001>

<bundles_post_ra>
// kernel: tpu_custom_call.1
= control target key start
LH: loop header
LB: loop body
LE: loop exit
PB: predicated region body
PF: predicated region fallthrough
CT: control target
= control target key end

     0   :  { %7 = vsyncpa [#allocation3], 0  ;;  %s855_s0 = inlined_call_operand.hbm [shape: f32[16,128], index: 0, kind: input, shape index: {}]   ;;  %s856_s1 = inlined_call_operand.hbm [shape: f32[16,128], index: 1, kind: input, shape index: {}]   ;;  %s857_s2 = inlined_call_operand.hbm [shape: f32[2,3,8,128], index: 2, kind: output, shape index: {}]  }
   0x1   :  { %9 = vsyncpa [#allocation3 + $0x1], 0 }
   0x2   :  { %10 = vsyncpa [#allocation6], 0 }
   0x3   :  { %12 = vsyncpa [#allocation6 + $0x1], 0 }
   0x4   :  { %13 = vsyncpa [#allocation4], 0 }
   0x5   :  { %15 = vsyncpa [#allocation4 + $0x1], 0  ;;  %s632_s9 = smov 0   ;;  %s634_s10 = smov 0  }
   0x6   :  { %s636_s11 = smov 0   ;;  %s638_s12 = smov 0  }
   0x7   :  { %s640_s13 = smov 0   ;;  %s642_s14 = smov 0  }
   0x8 LB: > { %s370_s15 = sadd.s32 4294967295, %s610_s14   ;;  %s371_s16 = sadd.s32 4294967294, %s610_s14   ;;  %s610_s14 = sphi %s642_s14, %s21_s14   ;;  %s606_s13 = sphi %s640_s13, %s877_s13   ;;  %s602_s12 = sphi %s638_s12, %s876_s12   ;;  %s598_s11 = sphi %s636_s11, %s875_s11   ;;  %s594_s10 = sphi %s634_s10, %s874_s10   ;;  %s590_s9 = sphi %s632_s9, %s873_s9  }
   0x9   : > { %s33_s17 = sadd.s32 1, %s606_s13  ;;  %s42_s18 = sadd.s32 1, %s598_s11 }
   0xa   : > { %p35_p0 = scmp.ge.s32.totalorder %s33_s17, 2  ;;  %p49_p1 = scmp.ne.s32.totalorder %s598_s11, %s594_s10 }
   0xb   : > { %p50_p2 = scmp.eq.s32.totalorder %s610_s14, 0  ;;  %p55_p3 = scmp.ne.s32.totalorder %s594_s10, %s590_s9 }
   0xc   : > { %s879_s17 = smov (%p35_p0, %s33_s17), 0  ;;  %p56_p5 = scmp.eq.s32.totalorder %s370_s15, 0 }
   0xd   : > { %p673_p4 = por %p50_p2, %p49_p1  ;;  %s39_s20 = ssub.s32 %s606_s13, %s879_s17 }
   0xe   : > { %p107_p6 = scmp.eq.s32.totalorder %s370_s15, 1  ;;  %p40_p7 = scmp.eq.s32.totalorder %s39_s20, 0 }
   0xf   : > { %p679_p8 = por %p56_p5, %p55_p3  ;;  %p113_p10 = scmp.eq.s32.totalorder %s371_s16, 1 }
  0x10   : > { %p683_p9 = por %p107_p6, %p49_p1  ;;  %p407_p13 = scmp.lt.s32.totalorder %s610_s14, 2 }
  0x11   : > { %s861_s21 = scalar_select %p679_p8, 1, 0 }
  0x12   : > { %s862_s22 = scalar_select %p683_p9, 1, 0 }
  0x13   : > { %s688_s23 = scalar_select %p40_p7, %s598_s11, %s42_s18  }
  0x14   : > { %p690_p11 = por %p113_p10, %p55_p3  ;;  %s697_s25 = sand.u32 1, %s598_s11  }
  0x15   : > { %s374_s26 = sshll.u32 %s697_s25, 3  ;;  %s375_s27 = sshll.u32 %s606_s13, 7 }
  0x16   : > { %s863_s24 = scalar_select %p690_p11, 1, 0 }
  0x17   : > { %s706_s30 = scalar_lea.hbm %s855_s0, %s375_s27  ;;  %s137_s3 = scalar_lea.vmem [#allocation2], %s374_s26 }
  0x18   : > { %s145_s4 = sshll.u32 %s137_s3, 4  ;;  %p714_p0 = pnand %p407_p13, %p673_p4  ;;  %s710_s4 = int_to_ptr.vmem [resolvable:$true] %s145_s4 }
  0x19   : > { %s134_s6 = scalar_lea.sflag [#allocation3], %s697_s25  ;;  %s464_s7 = scalar_lea.hbm %s706_s30, 128 }
  0x1a   : > { %p465_p3 = scmp.ne.s32.totalorder %s706_s30, %s464_s7  ;;  %p466_p5 = pneg %p714_p0 }
  0x1b   : > { %s469_s16 = scalar_lea.hbm %s855_s0, 256  ;;  %p470_p4 = scmp.lt.u32.totalorder %s706_s30, %s855_s0 }
  0x1c   : > { %p467_p6 = pnand %p466_p5, %p465_p3  ;;  %p471_p10 = scmp.lt.u32.totalorder %s469_s16, %s464_s7 }
  0x1d   : > { %p473_p12 = scmp.lt.u32.totalorder %s464_s7, %s706_s30 }
  0x1e   : > { %p468_p7 = pneg %p467_p6  ;;  %p472_p13 = por %p471_p10, %p470_p4 }
  0x20   : > { %p474_p1 = por %p473_p12, %p472_p13 }
  0x22   : > { %p475_p2 = pnand %p474_p1, %p468_p7 }
  0x24   : > { %478 = shalt.err (!%p475_p2)
}
  0x25   : > { %s479_s20 = scalar_lea.vmem %s710_s4, 128  ;;  %s612_s28 = smov [#allocation2]  }
  0x26   : > { %p480_p3 = scmp.ne.s32.totalorder %s710_s4, %s479_s20  ;;  %s484_s29 = sshll.u32 %s612_s28, 4  ;;  %s485_s29 = int_to_ptr.vmem [resolvable:$false] %s484_s29 }
  0x27   : > { %s486_s3 = scalar_lea.vmem %s485_s29, 256  ;;  %p487_p9 = scmp.lt.s32.totalorder %s710_s4, %s485_s29 }
  0x28   : > { %p482_p6 = pnand %p480_p3, %p466_p5  ;;  %p488_p4 = scmp.lt.s32.totalorder %s486_s3, %s479_s20 }
  0x2a   : > { %p483_p11 = pneg %p482_p6  ;;  %p489_p10 = por %p488_p4, %p487_p9 }
  0x2c   : > { %p490_p12 = pnand %p489_p10, %p483_p11 }
  0x2e   : > { %493 = shalt.err (!%p490_p12)
}
  0x2f   : > { %399 = dma.hbm_to_vmem [thread:$0]  (!%p714_p0), %s706_s30, 128, %s710_s4, %s134_s6  }
  0x30   : > { %p865_p1 = scmp.lt.s32.totalorder %s610_s14, 3  ;;  %p866_p2 = scmp.ge.s32.totalorder %s610_s14, 1 }
  0x31   : > { %s759_s16 = scalar_lea.hbm %s856_s1, %s375_s27  ;;  %s156_s18 = scalar_lea.vmem [#allocation5], %s374_s26 }
  0x32   : > { %p750_p7 = pnand %p866_p2, %p865_p1  ;;  %s164_s19 = sshll.u32 %s156_s18, 4  ;;  %s165_s19 = int_to_ptr.vmem [resolvable:$true] %s164_s19 }
  0x33   : > { %s153_s30 = scalar_lea.sflag [#allocation6], %s697_s25  ;;  %s494_s4 = scalar_lea.hbm %s759_s16, 128 }
  0x34   : > { %s867_s7 = scalar_select %p750_p7, 1, 0 }
  0x35   : > { %p495_p9 = scmp.ne.s32.totalorder %s759_s16, %s494_s4  ;;  %s499_s27 = scalar_lea.hbm %s856_s1, 256 }
  0x36   : > { %p500_p3 = scmp.lt.u32.totalorder %s759_s16, %s856_s1  ;;  %p501_p6 = scmp.lt.u32.totalorder %s499_s27, %s494_s4 }
  0x37   : > { %p497_p11 = pnand %p495_p9, %p466_p5  ;;  %p503_p10 = scmp.lt.u32.totalorder %s494_s4, %s759_s16 }
  0x38   : > { %p502_p4 = por %p501_p6, %p500_p3 }
  0x39   : > { %p498_p13 = pneg %p497_p11 }
  0x3a   : > { %p504_p12 = por %p503_p10, %p502_p4 }
  0x3c   : > { %p505_p1 = pnand %p504_p12, %p498_p13 }
  0x3e   : > { %508 = shalt.err (!%p505_p1)
}
  0x3f   : > { %s509_s25 = scalar_lea.vmem %s165_s19, 128  ;;  %s613_s26 = smov [#allocation5]  }
  0x40   : > { %p510_p2 = scmp.ne.s32.totalorder %s165_s19, %s509_s25  ;;  %s514_s3 = sshll.u32 %s613_s26, 4  ;;  %s515_s3 = int_to_ptr.vmem [resolvable:$false] %s514_s3 }
  0x41   : > { %s516_s8 = scalar_lea.vmem %s515_s3, 256  ;;  %p517_p8 = scmp.lt.s32.totalorder %s165_s19, %s515_s3 }
  0x42   : > { %p512_p9 = pnand %p510_p2, %p466_p5  ;;  %p518_p7 = scmp.lt.s32.totalorder %s516_s8, %s509_s25 }
  0x44   : > { %p513_p11 = pneg %p512_p9  ;;  %p519_p3 = por %p518_p7, %p517_p8 }
  0x46   : > { %p520_p6 = pnand %p519_p3, %p513_p11 }
  0x48   : > { %523 = shalt.err (!%p520_p6)
}
  0x49   : > { %402 = dma.hbm_to_vmem [thread:$0]  (!%p714_p0), %s759_s16, 128, %s165_s19, %s153_s30  }
  0x4a   : > { %p868_p13 = scmp.ne.s32.totalorder %s867_s7, 0 }
  0x4b   : > { %s786_s15 = sand.u32 (!%p868_p13), 1, %s594_s10   ;;  %p869_p5 = scmp.ne.s32.totalorder (!%p868_p13), %s861_s21, 0 }
  0x4c   : > { %173 = sbr.rel (%p868_p13) target bundleno = 127 (0x7f), region = 28  ;;  %s379_s18 = sshll.u32 (!%p868_p13), %s786_s15, 3 }
  0x4d   : > { %s176_s4 = scalar_lea.sflag (!%p868_p13), [#allocation3], %s786_s15  ;;  %s179_s6 = scalar_lea.vmem (!%p868_p13), [#allocation2], %s379_s18 }
  0x53   : > { %577 = dma.done.wait (%p869_p5), %s176_s4, 128  }
  0x54   : > { %579 = vsyncadd (%p869_p5), %s176_s4, 4294967168  ;;  %s185_s5 = scalar_lea.sflag [#allocation6], %s786_s15  ;;  %s188_s16 = scalar_lea.vmem [#allocation5], %s379_s18 }
  0x55   : > { %581 = dma.done.wait (%p869_p5), %s185_s5, 128  }
  0x56   : > { %583 = vsyncadd (%p869_p5), %s185_s5, 4294967168  ;;  %s388_s7 = smul.u32 24, %s786_s15  ;;  %v223_v0 = vld [vmem:[%s179_s6] sm:$0xff]  ;;  %v224_v1 = vld [vmem:[%s188_s16] sm:$0xff]  ;;  %s251_s29 = scalar_lea.sflag [#allocation4], %s786_s15 }
  0x57   : > { %460 = vlog2.f32 %v223_v0  ;;  %v228_v2 = vsub.f32 1.0, %v223_v0  ;;  %s389_s21 = smul.u32 384, %s602_s12  ;;  %p870_p0 = scmp.ne.s32.totalorder %s862_s22, 0 }
  0x58   : > { %s213_s19 = scalar_lea.vmem [#allocation7], %s388_s7  ;;  %s614_s12 = smov [#allocation7]  }
  0x59   : > { %462 = vlog2.f32 %v228_v2  ;;  %384 = vst [vmem:[%s213_s19 + $0x10] sm:$0xff] %v224_v1  ;;  %s264_s30 = sshll.u32 %s213_s19, 4  ;;  %s804_s28 = scalar_lea.hbm %s857_s2, %s389_s21  ;;  %s806_s30 = int_to_ptr.vmem [resolvable:$true] %s264_s30 }
  0x5a   : > { %s524_s25 = scalar_lea.vmem %s806_s30, 384  ;;  %s528_s26 = sshll.u32 %s614_s12, 4  ;;  %s529_s26 = int_to_ptr.vmem [resolvable:$false] %s528_s26 }
  0x5b   : > { %p525_p8 = scmp.ne.s32.totalorder %s806_s30, %s524_s25  ;;  %s530_s3 = scalar_lea.vmem %s529_s26, 768 }
  0x5c   : > { %p531_p10 = scmp.lt.s32.totalorder %s806_s30, %s529_s26  ;;  %p532_p12 = scmp.lt.s32.totalorder %s530_s3, %s524_s25 }
  0x5d   : > { %p526_p7 = pnand %p525_p8, %p870_p0 }
  0x5e   : > { %p533_p1 = por %p532_p12, %p531_p10 }
  0x5f   : > { %p527_p4 = pneg %p526_p7 }
  0x61   : > { %v461_v3 = vpop.eup %460  ;;  %p534_p2 = pnand %p533_p1, %p527_p4 }
  0x62   : > { %v226_v4 = vmul.f32 0.6931472, %v461_v3 }
  0x63   : > { %v463_v5 = vpop.eup %462 }
  0x64   : > { %v227_v6 = vmax.f32 %v226_v4, -100.0  ;;  %v230_v7 = vmul.f32 0.6931472, %v463_v5 }
  0x66   : > { %v231_v8 = vmax.f32 %v230_v7, -100.0 }
  0x68   : > { %v232_v9 = vsub.f32 %v227_v6, %v231_v8 }
  0x6a   : > { %v233_v10 = vmul.f32 %v232_v9, %v224_v1 }
  0x6c   : > { %v234_v11 = vadd.f32 %v233_v10, %v231_v8 }
  0x6e   : > { %v235_v12 = vmul.f32 %v234_v11, %v224_v1  ;;  %239 = vst [vmem:[%s213_s19] sm:$0xff] %v234_v11 }
  0x70   : > { %382 = vst [vmem:[%s213_s19 + $0x8] sm:$0xff] %v235_v12 }
  0x71   : > { %537 = shalt.err (!%p534_p2)
}
  0x72   : > { %s538_s8 = scalar_lea.hbm %s804_s28, 384  ;;  %s542_s6 = scalar_lea.hbm %s857_s2, 768 }
  0x73   : > { %p539_p9 = scmp.ne.s32.totalorder %s804_s28, %s538_s8  ;;  %p543_p6 = scmp.lt.u32.totalorder %s804_s28, %s857_s2 }
  0x74   : > { %p544_p13 = scmp.lt.u32.totalorder %s542_s6, %s538_s8  ;;  %p546_p8 = scmp.lt.u32.totalorder %s538_s8, %s804_s28 }
  0x75   : > { %p540_p11 = pnand %p539_p9, %p870_p0 }
  0x76   : > { %p545_p5 = por %p544_p13, %p543_p6 }
  0x77   : > { %p541_p3 = pneg %p540_p11 }
  0x78   : > { %p547_p7 = por %p546_p8, %p545_p5 }
  0x7a   : > { %p548_p4 = pnand %p547_p7, %p541_p3 }
  0x7c   : > { %551 = shalt.err (!%p548_p4)
}
  0x7d   : > { %s615_s7 = smov 128   ;;  %s616_s19 = smov 8  }
  0x7e   : > { %394 = dma.vmem_to_hbm [thread:$0]  (%p870_p0), %s806_s30, 384, %s804_s28, %s251_s29, %s615_s7, %s615_s7, %s616_s19  }
  0x7f PF: > { %s279_s21 = sand.u32 1, %s590_s9   ;;  %p871_p10 = scmp.ne.s32.totalorder %s863_s24, 0 }
  0x80   : > { %p872_p12 = scmp.ge.s32.totalorder %s610_s14, 2  ;;  %s280_s20 = scalar_lea.sflag [#allocation4], %s279_s21 }
  0x82   : > { %p404_p1 = pnand %p872_p12, %p871_p10 }
  0x84   : > { %585 = dma.done.wait (!%p404_p1), %s280_s20, 384  }
  0x85   : > { %587 = vsyncadd (!%p404_p1), %s280_s20, 4294966912  ;;  %s21_s14 = sadd.s32 1, %s610_s14   ;;  %s873_s9 = smov %s594_s10 }
  0x86   : > { %p18_p2 = scmp.ge.s32.totalorder %s21_s14, 4   ;;  %s874_s10 = smov %s598_s11 }
  0x87   : > { %s875_s11 = smov %s688_s23  ;;  %s876_s12 = smov %s606_s13 }
  0x88   : > { %s877_s13 = smov %s879_s17  ;;  %20 = sbr.rel (!%p18_p2) target bundleno = 8 (0x8), region = 92 }
  0x8f   :  { %285 = vsyncpa [#allocation3], 1 }
  0x90   :  { %287 = vsyncpa [#allocation3 + $0x1], 1 }
  0x91   :  { %288 = vsyncpa [#allocation6], 1 }
  0x92   :  { %290 = vsyncpa [#allocation6 + $0x1], 1 }
  0x93   :  { %291 = vsyncpa [#allocation4], 1 }
  0x94   :  { %293 = vsyncpa [#allocation4 + $0x1], 1 }

</bundles_post_ra>
